<compile_context>
chip_gen: v6e
topology: v6e:2x2x1
jax: 0.10.0
libtpu: 0.0.40
codegen_flags: <defaults>
</compile_context>

<pallas_src>
import functools

import jax
import jax.numpy as jnp
from jax.experimental import pallas as pl
from jax.experimental.pallas import tpu as pltpu


# Packed per-channel parameter rows (shape (P, C_out, 1)):
_IDX_BTR, _IDX_BN1S, _IDX_BN1B, _IDX_BP, _IDX_W0 = 0, 1, 2, 3, 4


def _pad_lanes(a, lo, hi):
    """Zero-pad a (C, L) value along the lane axis by lo/hi columns."""
    parts = []
    if lo:
        parts.append(jnp.zeros((a.shape[0], lo), jnp.float32))
    parts.append(a)
    if hi:
        parts.append(jnp.zeros((a.shape[0], hi), jnp.float32))
    return jnp.concatenate(parts, axis=1) if len(parts) > 1 else a


# ---------------------------------------------------------------------------
# Pallas kernel: whole block forward for one lane-chunk of nb batch elements.
# ---------------------------------------------------------------------------
def bc_conv_block_kernel(
    x_ref,          # (C_in, L)            L = nb * F * T, flat (batch, freq, time)
    wtr_ref,        # (C_out, C_in)        transition 1x1 conv weight
    wp_ref,         # (C_out, C_out)       pointwise 1x1 conv weight
    bred_ref,       # (L, nb*T)            mean-over-F reduction matrix (1/F entries)
    bexp_ref,       # (nb*T, L)            broadcast-over-F expansion matrix (0/1)
    ssn_scale_ref,  # (C_out, L)           SubSpectralNorm folded scale (per position)
    ssn_shift_ref,  # (C_out, L)           SubSpectralNorm folded shift (conv bias folded)
    cpar_ref,       # (4+f_ks+t_ks, C_out, 1)  packed per-channel params & tap weights
    fmask_ref,      # (f_ks, 1, L)         freq-boundary masks per tap
    tmask_ref,      # (t_ks, 1, nb*T)      time-boundary masks per tap
    out_ref,        # (C_out, L)
    *,
    has_transition: bool,
    F: int, T: int, nb: int,
    f_ks: int, t_ks: int, f_dil: int, t_dil: int,
):
    FT = F * T
    L = nb * FT
    Tt = nb * T
    f_pad = (f_ks - 1) * f_dil // 2
    t_pad = (t_ks - 1) * t_dil // 2
    idx_wf = _IDX_W0
    idx_wt = _IDX_W0 + f_ks
    C_out = wp_ref.shape[0]

    x = x_ref[...].astype(jnp.float32)                       # (C_in, L)

    # ---- transition 1x1 conv: one MXU matmul over channels -------------------
    if has_transition:
        y = jnp.dot(wtr_ref[...], x, preferred_element_type=jnp.float32)
        y = y + cpar_ref[_IDX_BTR]                           # (C_out, 1) bcast over lanes
    else:
        y = x                                                # C_in == C_out

    # ---- f2: depthwise frequency conv (shift-by-T lane slices + masks) -------
    y_pad = _pad_lanes(y, f_pad * T, ((f_ks - 1) * f_dil - f_pad) * T)
    z = jnp.zeros((C_out, L), jnp.float32)
    for k in range(f_ks):
        off = k * f_dil * T
        tap = y_pad[:, off:off + L]
        if k * f_dil != f_pad:            # boundary taps: zero out cross-segment reads
            tap = tap * fmask_ref[k]
        z = z + tap * cpar_ref[idx_wf + k]

    # ---- SubSpectralNorm (folded per-channel-per-position affine) ------------
    f2 = z * ssn_scale_ref[...] + ssn_shift_ref[...]         # (C_out, L)

    # ---- f1 branch: mean over frequency via MXU matmul -----------------------
    m = jnp.dot(f2, bred_ref[...], preferred_element_type=jnp.float32)   # (C_out, Tt)

    # depthwise time conv (same padding, stride 1) at reduced width
    m_pad = _pad_lanes(m, t_pad, (t_ks - 1) * t_dil - t_pad)
    u = jnp.zeros((C_out, Tt), jnp.float32)
    for k in range(t_ks):
        off = k * t_dil
        tap = m_pad[:, off:off + Tt]
        if k * t_dil != t_pad:
            tap = tap * tmask_ref[k]
        u = u + tap * cpar_ref[idx_wt + k]

    # BatchNorm (folded affine) + SiLU
    u = u * cpar_ref[_IDX_BN1S] + cpar_ref[_IDX_BN1B]
    u = u * jax.nn.sigmoid(u)

    # pointwise 1x1 conv (MXU) -- Dropout2d is identity in eval mode.
    v = jnp.dot(wp_ref[...], u, preferred_element_type=jnp.float32) + cpar_ref[_IDX_BP]

    # broadcast f1 back over frequency via the expansion matmul, add branches
    v_full = jnp.dot(v, bexp_ref[...], preferred_element_type=jnp.float32)  # (C_out, L)
    result = v_full + f2
    if not has_transition:
        result = result + x                                  # residual with original input
    out_ref[...] = result.astype(out_ref.dtype)


# ---------------------------------------------------------------------------
# Parameter init (deterministic, matches the nn.Module __init__ shapes).
# ---------------------------------------------------------------------------
def init_params(key, cfg):
    C_in, C_out, S = cfg["in_c"], cfg["out_c"], cfg["num_subbands"]
    f_ks, t_ks = cfg["f_ks"], cfg["t_ks"]
    ks = jax.random.split(key, 16)

    def nrm(k, shape, s):
        return s * jax.random.normal(k, shape, jnp.float32)

    p = {}
    p["w_tr"] = nrm(ks[0], (C_out, C_in, 1, 1), 0.3)
    p["b_tr"] = nrm(ks[1], (C_out,), 0.1)
    p["w_f"] = nrm(ks[2], (C_out, 1, f_ks, 1), 0.3)          # depthwise (groups=C_out)
    p["b_f"] = nrm(ks[3], (C_out,), 0.1)
    p["ssn_gamma"] = 1.0 + 0.1 * jax.random.normal(ks[4], (C_out * S,), jnp.float32)
    p["ssn_beta"] = 0.1 * jax.random.normal(ks[5], (C_out * S,), jnp.float32)
    p["ssn_mean"] = 0.1 * jax.random.normal(ks[6], (C_out * S,), jnp.float32)
    p["ssn_var"] = jax.random.uniform(ks[7], (C_out * S,), jnp.float32, 0.5, 1.5)
    p["w_t"] = nrm(ks[8], (C_out, 1, 1, t_ks), 0.3)           # depthwise (groups=C_out)
    p["b_t"] = nrm(ks[9], (C_out,), 0.1)
    p["bn1_gamma"] = 1.0 + 0.1 * jax.random.normal(ks[10], (C_out,), jnp.float32)
    p["bn1_beta"] = 0.1 * jax.random.normal(ks[11], (C_out,), jnp.float32)
    p["bn1_mean"] = 0.1 * jax.random.normal(ks[12], (C_out,), jnp.float32)
    p["bn1_var"] = jax.random.uniform(ks[13], (C_out,), jnp.float32, 0.5, 1.5)
    p["w_p"] = nrm(ks[14], (C_out, C_out, 1, 1), 0.3)
    p["b_p"] = nrm(ks[15], (C_out,), 0.1)
    return p


# ---------------------------------------------------------------------------
# Wrapper: fold BN/SSN, build membership matrices + masks, call pallas_call.
# ---------------------------------------------------------------------------
def bc_conv_block(x, p, cfg, *, batch_block=None):
    eps = 1e-5
    N, C_in, F, T = x.shape
    C_out, S = cfg["out_c"], cfg["num_subbands"]
    f_ks, t_ks = cfg["f_ks"], cfg["t_ks"]
    f_dil, t_dil = cfg["f_dilation"], cfg["t_dilation"]
    has_transition = C_in != C_out

    assert cfg["f_stride"] == 1 and cfg["t_stride"] == 1, "only stride-1 supported"
    assert F % S == 0
    assert (f_ks - 1) * f_dil % 2 == 0 and (t_ks - 1) * t_dil % 2 == 0, \
        "odd effective kernel sizes only (matches 'same'-shaped PyTorch block)"

    FT = F * T
    # Batch chunk per grid step: whole batch by default at these sizes (single
    # step, maximal lane width).  For large N pick nb so the block fits VMEM;
    # the chunk axis is the "parallel" grid axis (also what feeds 2 TCs on v7x).
    nb = batch_block if batch_block is not None else N
    assert N % nb == 0
    L = nb * FT
    n_blocks = N // nb
    if n_blocks > 1:
        assert L % 128 == 0, "lane-chunked batching needs nb*F*T % 128 == 0"

    f_pad = (f_ks - 1) * f_dil // 2
    t_pad = (t_ks - 1) * t_dil // 2
    f32 = jnp.float32

    # ---- fold SubSpectralNorm (+ f2 conv bias) into per-(channel, position) affine
    inv = 1.0 / jnp.sqrt(p["ssn_var"] + eps)
    cs_scale = (p["ssn_gamma"] * inv).reshape(C_out, S)
    cs_shift = (p["ssn_beta"] - p["ssn_mean"] * p["ssn_gamma"] * inv).reshape(C_out, S)
    cs_shift = cs_shift + p["b_f"][:, None] * cs_scale
    scale_F = jnp.repeat(cs_scale, F // S, axis=1)            # (C_out, F)
    shift_F = jnp.repeat(cs_shift, F // S, axis=1)
    ssn_scale_l = jnp.tile(jnp.repeat(scale_F, T, axis=1), (1, nb))   # (C_out, L)
    ssn_shift_l = jnp.tile(jnp.repeat(shift_F, T, axis=1), (1, nb))

    # ---- fold BatchNorm2d (+ f1 depthwise conv bias) into per-channel affine
    inv1 = 1.0 / jnp.sqrt(p["bn1_var"] + eps)
    bn1_scale = p["bn1_gamma"] * inv1
    bn1_shift = p["bn1_beta"] - p["bn1_mean"] * bn1_scale + p["b_t"] * bn1_scale

    # ---- pack per-channel scalars + depthwise tap weights into one array
    rows = [p["b_tr"], bn1_scale, bn1_shift, p["b_p"]]
    rows += [p["w_f"][:, 0, k, 0] for k in range(f_ks)]
    rows += [p["w_t"][:, 0, 0, k] for k in range(t_ks)]
    cpar = jnp.stack(rows).astype(f32)[:, :, None]            # (4+f_ks+t_ks, C_out, 1)

    # ---- membership matrices: mean over F (reduce) and broadcast over F (expand)
    blk = jnp.tile(jnp.eye(T, dtype=f32), (1, F))             # (T, F*T)
    b_exp = jnp.kron(jnp.eye(nb, dtype=f32), blk)             # (nb*T, L), 0/1
    b_red = b_exp.T / F                                       # (L, nb*T)

    # ---- precomputed boundary masks for the depthwise conv taps (hoisted)
    col = jnp.arange(L)
    fidx = (col % FT) // T
    fmask = jnp.stack(
        [((fidx + (k * f_dil - f_pad) >= 0) & (fidx + (k * f_dil - f_pad) < F)).astype(f32)
         for k in range(f_ks)])[:, None, :]                   # (f_ks, 1, L)
    tcol = jnp.arange(nb * T) % T
    tmask = jnp.stack(
        [((tcol + (k * t_dil - t_pad) >= 0) & (tcol + (k * t_dil - t_pad) < T)).astype(f32)
         for k in range(t_ks)])[:, None, :]                   # (t_ks, 1, nb*T)

    # ---- lane-dense activation layout: channels on sublanes, (b, f, t) on lanes
    x2 = jnp.transpose(x, (1, 0, 2, 3)).reshape(C_in, N * FT)
    w_tr = p["w_tr"][:, :, 0, 0].astype(f32)
    w_p = p["w_p"][:, :, 0, 0].astype(f32)

    kernel = functools.partial(
        bc_conv_block_kernel,
        has_transition=has_transition, F=F, T=T, nb=nb,
        f_ks=f_ks, t_ks=t_ks, f_dil=f_dil, t_dil=t_dil,
    )

    def const_spec(a):
        nd = a.ndim
        return pl.BlockSpec(a.shape, lambda i, _nd=nd: (0,) * _nd)

    consts = (w_tr, w_p, b_red, b_exp, ssn_scale_l, ssn_shift_l, cpar, fmask, tmask)

    out2 = pl.pallas_call(
        kernel,
        out_shape=jax.ShapeDtypeStruct((C_out, N * FT), x.dtype),
        grid=(n_blocks,),
        in_specs=[pl.BlockSpec((C_in, L), lambda i: (0, i))]
        + [const_spec(a) for a in consts],
        out_specs=pl.BlockSpec((C_out, L), lambda i: (0, i)),
        compiler_params=pltpu.CompilerParams(dimension_semantics=("parallel",)),
    )(x2, *consts)

    # back to NCHW
    return jnp.transpose(out2.reshape(C_out, N, F, T), (1, 0, 2, 3))


# ---------------------------------------------------------------------------
# Pure-JAX reference (mirrors the PyTorch forward in eval mode).
# ---------------------------------------------------------------------------
def reference(x, p, cfg):
    eps = 1e-5
    C_out, S = cfg["out_c"], cfg["num_subbands"]
    f_ks, t_ks = cfg["f_ks"], cfg["t_ks"]
    f_dil, t_dil = cfg["f_dilation"], cfg["t_dilation"]
    has_transition = x.shape[1] != C_out
    dn = ("NCHW", "OIHW", "NCHW")

    if has_transition:
        x = jax.lax.conv_general_dilated(
            x, p["w_tr"], (1, 1), "VALID", dimension_numbers=dn
        ) + p["b_tr"][None, :, None, None]

    f_pad = (f_ks - 1) * f_dil // 2
    z = jax.lax.conv_general_dilated(
        x, p["w_f"], (1, 1), padding=((f_pad, f_pad), (0, 0)),
        rhs_dilation=(f_dil, 1), dimension_numbers=dn, feature_group_count=C_out,
    ) + p["b_f"][None, :, None, None]

    N, C, F, T = z.shape
    zz = z.reshape(N, C * S, F // S, T)
    zz = ((zz - p["ssn_mean"][None, :, None, None])
          / jnp.sqrt(p["ssn_var"][None, :, None, None] + eps)
          * p["ssn_gamma"][None, :, None, None] + p["ssn_beta"][None, :, None, None])
    f2 = zz.reshape(N, C, F, T)

    m = f2.mean(axis=2, keepdims=True)
    t_pad = (t_ks - 1) * t_dil // 2
    u = jax.lax.conv_general_dilated(
        m, p["w_t"], (1, 1), padding=((0, 0), (t_pad, t_pad)),
        rhs_dilation=(1, t_dil), dimension_numbers=dn, feature_group_count=C_out,
    ) + p["b_t"][None, :, None, None]
    u = ((u - p["bn1_mean"][None, :, None, None])
         / jnp.sqrt(p["bn1_var"][None, :, None, None] + eps)
         * p["bn1_gamma"][None, :, None, None] + p["bn1_beta"][None, :, None, None])
    u = u * jax.nn.sigmoid(u)
    v = jax.lax.conv_general_dilated(
        u, p["w_p"], (1, 1), "VALID", dimension_numbers=dn
    ) + p["b_p"][None, :, None, None]

    result = v + f2
    if not has_transition:
        result = result + x
    return result


if __name__ == "__main__":
    key = jax.random.PRNGKey(0)
    k_param, k_x, k_param2, k_x2 = jax.random.split(key, 4)

    # Case 1: in_c != out_c (transition conv present)
    cfg = dict(in_c=4, out_c=8, f_ks=3, t_ks=3, f_stride=1, t_stride=1,
               f_dilation=1, t_dilation=1, num_subbands=4, dropout=0.1)
    N, F, T = 2, 16, 16
    p = init_params(k_param, cfg)
    x = jax.random.normal(k_x, (N, cfg["in_c"], F, T), jnp.float32)
    out = jax.block_until_ready(bc_conv_block(x, p, cfg))
    ref = reference(x, p, cfg)
    assert out.shape == (N, cfg["out_c"], F, T)
    assert jnp.allclose(out, ref, atol=1e-4, rtol=1e-3), float(jnp.max(jnp.abs(out - ref)))

    # Case 2: in_c == out_c (no transition, extra residual with x)
    cfg2 = dict(cfg, in_c=8)
    p2 = init_params(k_param2, cfg2)
    x2 = jax.random.normal(k_x2, (N, cfg2["in_c"], F, T), jnp.float32)
    out2 = jax.block_until_ready(bc_conv_block(x2, p2, cfg2))
    ref2 = reference(x2, p2, cfg2)
    assert jnp.allclose(out2, ref2, atol=1e-4, rtol=1e-3), float(jnp.max(jnp.abs(out2 - ref2)))

    # Case 3: chunked-batch grid path (one batch element per lane chunk, grid=(2,))
    out3 = jax.block_until_ready(bc_conv_block(x, p, cfg, batch_block=1))
    assert jnp.allclose(out3, ref, atol=1e-4, rtol=1e-3), float(jnp.max(jnp.abs(out3 - ref)))

    print("KERNEL_OK")
</pallas_src>

<mosaic_0001>
module attributes {stable_mosaic.version = 11 : i64} {
  func.func @bc_conv_block_kernel(%arg0: i32, %arg1: memref<4x512xf32, #tpu.memory_space<vmem>>, %arg2: memref<8x4xf32, #tpu.memory_space<vmem>>, %arg3: memref<8x8xf32, #tpu.memory_space<vmem>>, %arg4: memref<512x32xf32, #tpu.memory_space<vmem>>, %arg5: memref<32x512xf32, #tpu.memory_space<vmem>>, %arg6: memref<8x512xf32, #tpu.memory_space<vmem>>, %arg7: memref<8x512xf32, #tpu.memory_space<vmem>>, %arg8: memref<10x8x1xf32, #tpu.memory_space<vmem>>, %arg9: memref<3x1x512xf32, #tpu.memory_space<vmem>>, %arg10: memref<3x1x32xf32, #tpu.memory_space<vmem>>, %arg11: memref<8x512xf32, #tpu.memory_space<vmem>>) attributes {dimension_semantics = [#tpu.dimension_semantics<parallel>], iteration_bounds = array<i64: 1>, scalar_prefetch = 0 : i64, scratch_operands = 0 : i64, tpu.core_type = #tpu.core_type<tc>, window_params = [{transform_indices = @transform_0, window_bounds = array<i64: 4, 512>}, {pipeline_mode = #tpu.pipeline_mode<synchronous>, transform_indices = @transform_1, window_bounds = array<i64: 8, 4>}, {pipeline_mode = #tpu.pipeline_mode<synchronous>, transform_indices = @transform_2, window_bounds = array<i64: 8, 8>}, {pipeline_mode = #tpu.pipeline_mode<synchronous>, transform_indices = @transform_3, window_bounds = array<i64: 512, 32>}, {pipeline_mode = #tpu.pipeline_mode<synchronous>, transform_indices = @transform_4, window_bounds = array<i64: 32, 512>}, {pipeline_mode = #tpu.pipeline_mode<synchronous>, transform_indices = @transform_5, window_bounds = array<i64: 8, 512>}, {pipeline_mode = #tpu.pipeline_mode<synchronous>, transform_indices = @transform_6, window_bounds = array<i64: 8, 512>}, {pipeline_mode = #tpu.pipeline_mode<synchronous>, transform_indices = @transform_7, window_bounds = array<i64: 10, 8, 1>}, {pipeline_mode = #tpu.pipeline_mode<synchronous>, transform_indices = @transform_8, window_bounds = array<i64: 3, 1, 512>}, {pipeline_mode = #tpu.pipeline_mode<synchronous>, transform_indices = @transform_9, window_bounds = array<i64: 3, 1, 32>}, {transform_indices = @transform_10, window_bounds = array<i64: 8, 512>}]} {
    %c0 = arith.constant 0 : index
    %c0_0 = arith.constant 0 : index
    %0 = vector.load %arg1[%c0, %c0_0] : memref<4x512xf32, #tpu.memory_space<vmem>>, vector<4x512xf32>
    %c0_1 = arith.constant 0 : index
    %c0_2 = arith.constant 0 : index
    %1 = vector.load %arg2[%c0_1, %c0_2] : memref<8x4xf32, #tpu.memory_space<vmem>>, vector<8x4xf32>
    %cst = arith.constant dense<0.000000e+00> : vector<8x512xf32>
    %2 = tpu.matmul %1, %0, %cst {dimension_numbers = #tpu.dot_dimension_numbers<[1], [0], [0], [1], [0, 0, 1, 1], [], []>} : vector<8x4xf32>, vector<4x512xf32>, vector<8x512xf32> -> vector<8x512xf32>
    %c0_3 = arith.constant 0 : index
    %c0_4 = arith.constant 0 : index
    %c0_5 = arith.constant 0 : index
    %3 = vector.load %arg8[%c0_3, %c0_4, %c0_5] : memref<10x8x1xf32, #tpu.memory_space<vmem>>, vector<1x8x1xf32>
    %4 = vector.shape_cast %3 : vector<1x8x1xf32> to vector<8x1xf32>
    %5 = vector.broadcast %4 : vector<8x1xf32> to vector<8x512xf32>
    %6 = arith.addf %2, %5 : vector<8x512xf32>
    %cst_6 = arith.constant 0.000000e+00 : f32
    %7 = vector.broadcast %cst_6 : f32 to vector<8x16xf32>
    %cst_7 = arith.constant 0.000000e+00 : f32
    %8 = vector.broadcast %cst_7 : f32 to vector<8x16xf32>
    %9 = tpu.concatenate %7, %6, %8 in 1 : vector<8x16xf32>, vector<8x512xf32>, vector<8x16xf32> -> vector<8x544xf32>
    %cst_8 = arith.constant 0.000000e+00 : f32
    %10 = vector.broadcast %cst_8 : f32 to vector<8x512xf32>
    %11 = vector.extract_strided_slice %9 {offsets = [0, 0], sizes = [8, 512], strides = [1, 1]} : vector<8x544xf32> to vector<8x512xf32>
    %c0_9 = arith.constant 0 : index
    %c0_10 = arith.constant 0 : index
    %c0_11 = arith.constant 0 : index
    %12 = vector.load %arg9[%c0_9, %c0_10, %c0_11] : memref<3x1x512xf32, #tpu.memory_space<vmem>>, vector<1x1x512xf32>
    %13 = vector.shape_cast %12 : vector<1x1x512xf32> to vector<1x512xf32>
    %14 = vector.broadcast %13 : vector<1x512xf32> to vector<8x512xf32>
    %15 = arith.mulf %11, %14 : vector<8x512xf32>
    %c4 = arith.constant 4 : index
    %c0_12 = arith.constant 0 : index
    %c0_13 = arith.constant 0 : index
    %16 = vector.load %arg8[%c4, %c0_12, %c0_13] : memref<10x8x1xf32, #tpu.memory_space<vmem>>, vector<1x8x1xf32>
    %17 = vector.shape_cast %16 : vector<1x8x1xf32> to vector<8x1xf32>
    %18 = vector.broadcast %17 : vector<8x1xf32> to vector<8x512xf32>
    %19 = arith.mulf %15, %18 : vector<8x512xf32>
    %20 = arith.addf %10, %19 : vector<8x512xf32>
    %21 = vector.extract_strided_slice %9 {offsets = [0, 16], sizes = [8, 512], strides = [1, 1]} : vector<8x544xf32> to vector<8x512xf32>
    %c5 = arith.constant 5 : index
    %c0_14 = arith.constant 0 : index
    %c0_15 = arith.constant 0 : index
    %22 = vector.load %arg8[%c5, %c0_14, %c0_15] : memref<10x8x1xf32, #tpu.memory_space<vmem>>, vector<1x8x1xf32>
    %23 = vector.shape_cast %22 : vector<1x8x1xf32> to vector<8x1xf32>
    %24 = vector.broadcast %23 : vector<8x1xf32> to vector<8x512xf32>
    %25 = arith.mulf %21, %24 : vector<8x512xf32>
    %26 = arith.addf %20, %25 : vector<8x512xf32>
    %27 = vector.extract_strided_slice %9 {offsets = [0, 32], sizes = [8, 512], strides = [1, 1]} : vector<8x544xf32> to vector<8x512xf32>
    %c2 = arith.constant 2 : index
    %c0_16 = arith.constant 0 : index
    %c0_17 = arith.constant 0 : index
    %28 = vector.load %arg9[%c2, %c0_16, %c0_17] : memref<3x1x512xf32, #tpu.memory_space<vmem>>, vector<1x1x512xf32>
    %29 = vector.shape_cast %28 : vector<1x1x512xf32> to vector<1x512xf32>
    %30 = vector.broadcast %29 : vector<1x512xf32> to vector<8x512xf32>
    %31 = arith.mulf %27, %30 : vector<8x512xf32>
    %c6 = arith.constant 6 : index
    %c0_18 = arith.constant 0 : index
    %c0_19 = arith.constant 0 : index
    %32 = vector.load %arg8[%c6, %c0_18, %c0_19] : memref<10x8x1xf32, #tpu.memory_space<vmem>>, vector<1x8x1xf32>
    %33 = vector.shape_cast %32 : vector<1x8x1xf32> to vector<8x1xf32>
    %34 = vector.broadcast %33 : vector<8x1xf32> to vector<8x512xf32>
    %35 = arith.mulf %31, %34 : vector<8x512xf32>
    %36 = arith.addf %26, %35 : vector<8x512xf32>
    %c0_20 = arith.constant 0 : index
    %c0_21 = arith.constant 0 : index
    %37 = vector.load %arg6[%c0_20, %c0_21] : memref<8x512xf32, #tpu.memory_space<vmem>>, vector<8x512xf32>
    %38 = arith.mulf %36, %37 : vector<8x512xf32>
    %c0_22 = arith.constant 0 : index
    %c0_23 = arith.constant 0 : index
    %39 = vector.load %arg7[%c0_22, %c0_23] : memref<8x512xf32, #tpu.memory_space<vmem>>, vector<8x512xf32>
    %40 = arith.addf %38, %39 : vector<8x512xf32>
    %c0_24 = arith.constant 0 : index
    %c0_25 = arith.constant 0 : index
    %41 = vector.load %arg4[%c0_24, %c0_25] : memref<512x32xf32, #tpu.memory_space<vmem>>, vector<512x32xf32>
    %cst_26 = arith.constant dense<0.000000e+00> : vector<8x32xf32>
    %42 = tpu.matmul %40, %41, %cst_26 {dimension_numbers = #tpu.dot_dimension_numbers<[1], [0], [0], [1], [0, 0, 1, 1], [], []>} : vector<8x512xf32>, vector<512x32xf32>, vector<8x32xf32> -> vector<8x32xf32>
    %cst_27 = arith.constant 0.000000e+00 : f32
    %43 = vector.broadcast %cst_27 : f32 to vector<8x1xf32>
    %cst_28 = arith.constant 0.000000e+00 : f32
    %44 = vector.broadcast %cst_28 : f32 to vector<8x1xf32>
    %45 = tpu.concatenate %43, %42, %44 in 1 : vector<8x1xf32>, vector<8x32xf32>, vector<8x1xf32> -> vector<8x34xf32>
    %cst_29 = arith.constant 0.000000e+00 : f32
    %46 = vector.broadcast %cst_29 : f32 to vector<8x32xf32>
    %47 = vector.extract_strided_slice %45 {offsets = [0, 0], sizes = [8, 32], strides = [1, 1]} : vector<8x34xf32> to vector<8x32xf32>
    %c0_30 = arith.constant 0 : index
    %c0_31 = arith.constant 0 : index
    %c0_32 = arith.constant 0 : index
    %48 = vector.load %arg10[%c0_30, %c0_31, %c0_32] : memref<3x1x32xf32, #tpu.memory_space<vmem>>, vector<1x1x32xf32>
    %49 = vector.shape_cast %48 : vector<1x1x32xf32> to vector<1x32xf32>
    %50 = vector.broadcast %49 : vector<1x32xf32> to vector<8x32xf32>
    %51 = arith.mulf %47, %50 : vector<8x32xf32>
    %c7 = arith.constant 7 : index
    %c0_33 = arith.constant 0 : index
    %c0_34 = arith.constant 0 : index
    %52 = vector.load %arg8[%c7, %c0_33, %c0_34] : memref<10x8x1xf32, #tpu.memory_space<vmem>>, vector<1x8x1xf32>
    %53 = vector.shape_cast %52 : vector<1x8x1xf32> to vector<8x1xf32>
    %54 = vector.broadcast %53 : vector<8x1xf32> to vector<8x32xf32>
    %55 = arith.mulf %51, %54 : vector<8x32xf32>
    %56 = arith.addf %46, %55 : vector<8x32xf32>
    %57 = vector.extract_strided_slice %45 {offsets = [0, 1], sizes = [8, 32], strides = [1, 1]} : vector<8x34xf32> to vector<8x32xf32>
    %c8 = arith.constant 8 : index
    %c0_35 = arith.constant 0 : index
    %c0_36 = arith.constant 0 : index
    %58 = vector.load %arg8[%c8, %c0_35, %c0_36] : memref<10x8x1xf32, #tpu.memory_space<vmem>>, vector<1x8x1xf32>
    %59 = vector.shape_cast %58 : vector<1x8x1xf32> to vector<8x1xf32>
    %60 = vector.broadcast %59 : vector<8x1xf32> to vector<8x32xf32>
    %61 = arith.mulf %57, %60 : vector<8x32xf32>
    %62 = arith.addf %56, %61 : vector<8x32xf32>
    %63 = vector.extract_strided_slice %45 {offsets = [0, 2], sizes = [8, 32], strides = [1, 1]} : vector<8x34xf32> to vector<8x32xf32>
    %c2_37 = arith.constant 2 : index
    %c0_38 = arith.constant 0 : index
    %c0_39 = arith.constant 0 : index
    %64 = vector.load %arg10[%c2_37, %c0_38, %c0_39] : memref<3x1x32xf32, #tpu.memory_space<vmem>>, vector<1x1x32xf32>
    %65 = vector.shape_cast %64 : vector<1x1x32xf32> to vector<1x32xf32>
    %66 = vector.broadcast %65 : vector<1x32xf32> to vector<8x32xf32>
    %67 = arith.mulf %63, %66 : vector<8x32xf32>
    %c9 = arith.constant 9 : index
    %c0_40 = arith.constant 0 : index
    %c0_41 = arith.constant 0 : index
    %68 = vector.load %arg8[%c9, %c0_40, %c0_41] : memref<10x8x1xf32, #tpu.memory_space<vmem>>, vector<1x8x1xf32>
    %69 = vector.shape_cast %68 : vector<1x8x1xf32> to vector<8x1xf32>
    %70 = vector.broadcast %69 : vector<8x1xf32> to vector<8x32xf32>
    %71 = arith.mulf %67, %70 : vector<8x32xf32>
    %72 = arith.addf %62, %71 : vector<8x32xf32>
    %c1 = arith.constant 1 : index
    %c0_42 = arith.constant 0 : index
    %c0_43 = arith.constant 0 : index
    %73 = vector.load %arg8[%c1, %c0_42, %c0_43] : memref<10x8x1xf32, #tpu.memory_space<vmem>>, vector<1x8x1xf32>
    %74 = vector.shape_cast %73 : vector<1x8x1xf32> to vector<8x1xf32>
    %75 = vector.broadcast %74 : vector<8x1xf32> to vector<8x32xf32>
    %76 = arith.mulf %72, %75 : vector<8x32xf32>
    %c2_44 = arith.constant 2 : index
    %c0_45 = arith.constant 0 : index
    %c0_46 = arith.constant 0 : index
    %77 = vector.load %arg8[%c2_44, %c0_45, %c0_46] : memref<10x8x1xf32, #tpu.memory_space<vmem>>, vector<1x8x1xf32>
    %78 = vector.shape_cast %77 : vector<1x8x1xf32> to vector<8x1xf32>
    %79 = vector.broadcast %78 : vector<8x1xf32> to vector<8x32xf32>
    %80 = arith.addf %76, %79 : vector<8x32xf32>
    %81 = arith.negf %80 : vector<8x32xf32>
    %82 = math.exp %81 : vector<8x32xf32>
    %cst_47 = arith.constant 1.000000e+00 : f32
    %83 = vector.broadcast %cst_47 : f32 to vector<8x32xf32>
    %84 = arith.addf %83, %82 : vector<8x32xf32>
    %85 = arith.divf %83, %84 : vector<8x32xf32>
    %86 = arith.mulf %80, %85 : vector<8x32xf32>
    %c0_48 = arith.constant 0 : index
    %c0_49 = arith.constant 0 : index
    %87 = vector.load %arg3[%c0_48, %c0_49] : memref<8x8xf32, #tpu.memory_space<vmem>>, vector<8x8xf32>
    %cst_50 = arith.constant dense<0.000000e+00> : vector<8x32xf32>
    %88 = tpu.matmul %87, %86, %cst_50 {dimension_numbers = #tpu.dot_dimension_numbers<[1], [0], [0], [1], [0, 0, 1, 1], [], []>} : vector<8x8xf32>, vector<8x32xf32>, vector<8x32xf32> -> vector<8x32xf32>
    %c3 = arith.constant 3 : index
    %c0_51 = arith.constant 0 : index
    %c0_52 = arith.constant 0 : index
    %89 = vector.load %arg8[%c3, %c0_51, %c0_52] : memref<10x8x1xf32, #tpu.memory_space<vmem>>, vector<1x8x1xf32>
    %90 = vector.shape_cast %89 : vector<1x8x1xf32> to vector<8x1xf32>
    %91 = vector.broadcast %90 : vector<8x1xf32> to vector<8x32xf32>
    %92 = arith.addf %88, %91 : vector<8x32xf32>
    %c0_53 = arith.constant 0 : index
    %c0_54 = arith.constant 0 : index
    %93 = vector.load %arg5[%c0_53, %c0_54] : memref<32x512xf32, #tpu.memory_space<vmem>>, vector<32x512xf32>
    %cst_55 = arith.constant dense<0.000000e+00> : vector<8x512xf32>
    %94 = tpu.matmul %92, %93, %cst_55 {dimension_numbers = #tpu.dot_dimension_numbers<[1], [0], [0], [1], [0, 0, 1, 1], [], []>} : vector<8x32xf32>, vector<32x512xf32>, vector<8x512xf32> -> vector<8x512xf32>
    %95 = arith.addf %94, %40 : vector<8x512xf32>
    %c0_56 = arith.constant 0 : index
    %c0_57 = arith.constant 0 : index
    %96 = vector.load %arg11[%c0_56, %c0_57] : memref<8x512xf32, #tpu.memory_space<vmem>>, vector<8x512xf32>
    tpu.vector_store %arg11[%c0_56, %c0_57], %95 {strides = array<i32>} : memref<8x512xf32, #tpu.memory_space<vmem>>, vector<8x512xf32>,
    return
  }
  func.func @transform_0(%arg0: i32) -> (i32, i32) {
    %c0_i32 = arith.constant 0 : i32
    %c0_i32_0 = arith.constant 0 : i32
    return %c0_i32, %arg0 : i32, i32
  }
  func.func @transform_1(%arg0: i32) -> (i32, i32) {
    %c0_i32 = arith.constant 0 : i32
    %c0_i32_0 = arith.constant 0 : i32
    %c0_i32_1 = arith.constant 0 : i32
    return %c0_i32, %c0_i32_0 : i32, i32
  }
  func.func @transform_2(%arg0: i32) -> (i32, i32) {
    %c0_i32 = arith.constant 0 : i32
    %c0_i32_0 = arith.constant 0 : i32
    %c0_i32_1 = arith.constant 0 : i32
    return %c0_i32, %c0_i32_0 : i32, i32
  }
  func.func @transform_3(%arg0: i32) -> (i32, i32) {
    %c0_i32 = arith.constant 0 : i32
    %c0_i32_0 = arith.constant 0 : i32
    %c0_i32_1 = arith.constant 0 : i32
    return %c0_i32, %c0_i32_0 : i32, i32
  }
  func.func @transform_4(%arg0: i32) -> (i32, i32) {
    %c0_i32 = arith.constant 0 : i32
    %c0_i32_0 = arith.constant 0 : i32
    %c0_i32_1 = arith.constant 0 : i32
    return %c0_i32, %c0_i32_0 : i32, i32
  }
  func.func @transform_5(%arg0: i32) -> (i32, i32) {
    %c0_i32 = arith.constant 0 : i32
    %c0_i32_0 = arith.constant 0 : i32
    %c0_i32_1 = arith.constant 0 : i32
    return %c0_i32, %c0_i32_0 : i32, i32
  }
  func.func @transform_6(%arg0: i32) -> (i32, i32) {
    %c0_i32 = arith.constant 0 : i32
    %c0_i32_0 = arith.constant 0 : i32
    %c0_i32_1 = arith.constant 0 : i32
    return %c0_i32, %c0_i32_0 : i32, i32
  }
  func.func @transform_7(%arg0: i32) -> (i32, i32, i32) {
    %c0_i32 = arith.constant 0 : i32
    %c0_i32_0 = arith.constant 0 : i32
    %c0_i32_1 = arith.constant 0 : i32
    %c0_i32_2 = arith.constant 0 : i32
    return %c0_i32, %c0_i32_0, %c0_i32_1 : i32, i32, i32
  }
  func.func @transform_8(%arg0: i32) -> (i32, i32, i32) {
    %c0_i32 = arith.constant 0 : i32
    %c0_i32_0 = arith.constant 0 : i32
    %c0_i32_1 = arith.constant 0 : i32
    %c0_i32_2 = arith.constant 0 : i32
    return %c0_i32, %c0_i32_0, %c0_i32_1 : i32, i32, i32
  }
  func.func @transform_9(%arg0: i32) -> (i32, i32, i32) {
    %c0_i32 = arith.constant 0 : i32
    %c0_i32_0 = arith.constant 0 : i32
    %c0_i32_1 = arith.constant 0 : i32
    %c0_i32_2 = arith.constant 0 : i32
    return %c0_i32, %c0_i32_0, %c0_i32_1 : i32, i32, i32
  }
  func.func @transform_10(%arg0: i32) -> (i32, i32) {
    %c0_i32 = arith.constant 0 : i32
    %c0_i32_0 = arith.constant 0 : i32
    return %c0_i32, %arg0 : i32, i32
  }
}

</mosaic_0001>

<bundles_post_ra>
// kernel: tpu_custom_call.1
= control target key start
LH: loop header
LB: loop body
LE: loop exit
PB: predicated region body
PF: predicated region fallthrough
CT: control target
= control target key end

     0   :  { %vm53_vm0 = vcmask 1043456   ;;  %v1097_v4 = vmov 0.0   ;;  %v229_v5 = vlaneseq  ;;  %vm49_vm1 = vcmask 31744   ;;  %s1594_s0 = inlined_call_operand.vmem [shape: f32[4,512], index: 0, kind: input, shape index: {}]   ;;  %s1595_s1 = inlined_call_operand.vmem [shape: f32[8,4], index: 1, kind: input, shape index: {}]   ;;  %s1596_s2 = inlined_call_operand.vmem [shape: f32[8,8], index: 2, kind: input, shape index: {}]   ;;  %s1597_s3 = inlined_call_operand.vmem [shape: f32[512,32], index: 3, kind: input, shape index: {}]   ;;  %s1598_s4 = inlined_call_operand.vmem [shape: f32[32,512], index: 4, kind: input, shape index: {}]   ;;  %s1599_s5 = inlined_call_operand.vmem [shape: f32[8,512], index: 5, kind: input, shape index: {}]   ;;  %s1600_s6 = inlined_call_operand.vmem [shape: f32[8,512], index: 6, kind: input, shape index: {}]   ;;  %s1601_s7 = inlined_call_operand.vmem [shape: f32[10,8,1], index: 7, kind: input, shape index: {}]   ;;  %s1602_s8 = inlined_call_operand.vmem [shape: f32[3,1,512], index: 8, kind: input, shape index: {}]   ;;  %s1603_s9 = inlined_call_operand.vmem [shape: f32[3,1,32], index: 9, kind: input, shape index: {}]   ;;  %s1604_s10 = inlined_call_operand.hbm [shape: f32[8,512], index: 10, kind: output, shape index: {}]  }
   0x1   :  { %v36_v0 = vld [vmem:[%s1594_s0] sm:$0xff]  ;;  %v37_v1 = vld [vmem:[%s1594_s0 + $0x8] sm:$0xff]  ;;  %126 = vmatprep.mubr.f32.mxu0 %v1097_v4  ;;  %197 = vmatprep.mubr.f32.mxu1 %v1097_v4  ;;  %v1098_v7 = vmov 0  }
   0x2   :  { %v47_v2 = vcombine.high %v36_v0, %v36_v0  ;;  %v48_v3 = vcombine.high %v37_v1, %v37_v1  ;;  %v38_v6 = vld [vmem:[%s1595_s1] sm:$0xff]  ;;  %1067 = vset.pattern.permute.xlu0 %v1098_v7  ;;  %1068 = vset.pattern.permute.xlu1 %v1098_v7 }
   0x3   :  { %15 = vsyncpa [#allocation3], 0  ;;  %v39_v8 = vld [vmem:[%s1601_s7] sm:$0xff]  ;;  %v964_v9 = vld [vmem:[%s1601_s7 + $0x30] sm:$0xff]  ;;  %v1183_v10 = vshrl.u32 %v229_v5, 7  ;;  %s1099_s25 = smov 32  }
   0x4   :  { %955 = vmatprep.subr.msk.mxu0 %vm53_vm0, %v47_v2  ;;  %958 = vmatprep.subr.msk.mxu1 %vm53_vm0, %v48_v3  ;;  %v963_v11 = vld [vmem:[%s1602_s8 + $0x8] sm:$0xf]  ;;  %s1100_s26 = smov 16   ;;  %v961_v30 = vld [vmem:[%s1601_s7 + $0x20] sm:$0xff]  ;;  %v468_v31 = vld [vmem:[%s1597_s3 + $0x1f8] sm:$0xff]  ;;  %vm216_vm2 = vcmask 130048  }
   0x5   :  { %956 = vmatpush1.msk.msra.mxu0 %vm53_vm0, %v36_v0  ;;  %959 = vmatpush1.msk.msra.mxu1 %vm53_vm0, %v37_v1  ;;  %v231_v12 = vsub.s32 0, %v1183_v10  ;;  %v235_v13 = vsub.s32 1, %v1183_v10  ;;  %v962_v14 = vld [vmem:[%s1601_s7 + $0x28] sm:$0xff]  ;;  %v239_v23 = vsub.s32 2, %v1183_v10  ;;  %v243_v26 = vsub.s32 3, %v1183_v10  ;;  %v452_v32 = vld [vmem:[%s1597_s3 + $0x178] sm:$0xff] }
   0x6   :  { %957 = vmatmul.mubr.msk.f32.vlgmr.msra.gmra.mxu0 %vm49_vm1, %v38_v6  ;;  %960 = vmatmul.mubr.msk.f32.vlgmr.msra.gmra.mxu1 %vm49_vm1, %v38_v6  ;;  %v467_v33 = vld [vmem:[%s1597_s3 + $0x1f0] sm:$0xff]  ;;  %v436_v34 = vld [vmem:[%s1597_s3 + $0xf8] sm:$0xff]  ;;  %v466_v37 = vld [vmem:[%s1597_s3 + $0x1e8] sm:$0xff]  ;;  %s1101_s23 = smov 112   ;;  %vm335_vm3 = vcmask 261120   ;;  %s1102_s21 = smov 96  }
   0x7   :  { %42 = vperm.xlu0 %1067, %v39_v8   ;;  %353 = vperm.xlu1 %1068, %v964_v9   ;;  %v314_v15 = vrot.slane %v963_v11, %v231_v12  ;;  %v318_v16 = vrot.slane %v963_v11, %v235_v13  ;;  %v322_v28 = vrot.slane %v963_v11, %v239_v23  ;;  %v451_v35 = vld [vmem:[%s1597_s3 + $0x170] sm:$0xff]  ;;  %v420_v36 = vld [vmem:[%s1597_s3 + $0x78] sm:$0xff]  ;;  %v450_v39 = vld [vmem:[%s1597_s3 + $0x168] sm:$0xff]  ;;  %s1103_s13 = smov 2   ;;  %vm295_vm4 = vcmask 916480   ;;  %s1106_s15 = smov 126  }
   0x8   :  { %v326_v29 = vrot.slane %v963_v11, %v243_v26  ;;  %1013 = vmatprep.subr.mxu1 %v468_v31  ;;  %978 = vmatprep.subr.mxu0 %v436_v34  ;;  %v435_v38 = vld [vmem:[%s1597_s3 + $0xf0] sm:$0xff]  ;;  %v434_v41 = vld [vmem:[%s1597_s3 + $0xe8] sm:$0xff]  ;;  %v465_v42 = vld [vmem:[%s1597_s3 + $0x1e0] sm:$0xff]  ;;  %vm376_vm5 = vcmask 785408   ;;  %vm613_vm6 = vcmask 7168   ;;  %vm615_vm7 = vcmask 269312  }
   0x9   :  { %1014 = vmatpush3.msra.mxu1 %v452_v32  ;;  %979 = vmatpush3.msra.mxu0 %v420_v36  ;;  %v419_v40 = vld [vmem:[%s1597_s3 + $0x70] sm:$0xff]  ;;  %v449_v43 = vld [vmem:[%s1597_s3 + $0x160] sm:$0xff]  ;;  %v418_v45 = vld [vmem:[%s1597_s3 + $0x68] sm:$0xff]  ;;  %vm1107_vm8 = vmmov 0   ;;  %vm702_vm9 = vcmask 64512   ;;  %s1108_s20 = smov [#allocation2]  }
   0xa   :  { %1015 = vmatprep.subr.mxu1 %v467_v33  ;;  %980 = vmatprep.subr.mxu0 %v435_v38  ;;  %v464_v46 = vld [vmem:[%s1597_s3 + $0x1d8] sm:$0xff]  ;;  %v433_v47 = vld [vmem:[%s1597_s3 + $0xe0] sm:$0xff]  ;;  %v463_v50 = vld [vmem:[%s1597_s3 + $0x1d0] sm:$0xff] }
   0xb   :  { %272 = vperm.xlu0 %1067, %v962_v14   ;;  %327 = vrot.lane.b32.xlu1 %v314_v15, %s1099_s25  ;;  %v448_v48 = vld [vmem:[%s1597_s3 + $0x158] sm:$0xff]  ;;  %v417_v49 = vld [vmem:[%s1597_s3 + $0x60] sm:$0xff]  ;;  %v447_v52 = vld [vmem:[%s1597_s3 + $0x150] sm:$0xff] }
   0xc   :  { %1016 = vmatpush3.msra.mxu1 %v451_v35  ;;  %981 = vmatpush3.msra.mxu0 %v419_v40  ;;  %v432_v51 = vld [vmem:[%s1597_s3 + $0xd8] sm:$0xff]  ;;  %v462_v56 = vld [vmem:[%s1597_s3 + $0x1c8] sm:$0xff]  ;;  %v431_v57 = vld [vmem:[%s1597_s3 + $0xd0] sm:$0xff] }
   0xd   :  { %1017 = vmatprep.subr.mxu1 %v466_v37  ;;  %982 = vmatprep.subr.mxu0 %v434_v41  ;;  %v416_v55 = vld [vmem:[%s1597_s3 + $0x58] sm:$0xff]  ;;  %v446_v58 = vld [vmem:[%s1597_s3 + $0x148] sm:$0xff]  ;;  %v415_v59 = vld [vmem:[%s1597_s3 + $0x50] sm:$0xff] }
   0xe   :  { %1018 = vmatpush3.msra.mxu1 %v450_v39  ;;  %983 = vmatpush3.msra.mxu0 %v418_v45  ;;  %v461_v60 = vld [vmem:[%s1597_s3 + $0x1c0] sm:$0xff]  ;;  %v430_v61 = vld [vmem:[%s1597_s3 + $0xc8] sm:$0xff]  ;;  %v460_v1 = vld [vmem:[%s1597_s3 + $0x1b8] sm:$0xff] }
   0xf   :  { %329 = vrot.lane.b32.xlu0 %v318_v16, %s1099_s25  ;;  %1019 = vmatprep.subr.mxu1 %v465_v42  ;;  %v445_v62 = vld [vmem:[%s1597_s3 + $0x140] sm:$0xff]  ;;  %v414_v0 = vld [vmem:[%s1597_s3 + $0x48] sm:$0xff]  ;;  %v444_v3 = vld [vmem:[%s1597_s3 + $0x138] sm:$0xff] }
  0x10   :  { %1020 = vmatpush3.msra.mxu1 %v449_v43  ;;  %984 = vmatprep.subr.mxu0 %v433_v47  ;;  %v429_v2 = vld [vmem:[%s1597_s3 + $0xc0] sm:$0xff]  ;;  %v459_v7 = vld [vmem:[%s1597_s3 + $0x1b0] sm:$0xff]  ;;  %v428_v8 = vld [vmem:[%s1597_s3 + $0xb8] sm:$0xff] }
  0x11   :  { %1021 = vmatprep.subr.mxu1 %v464_v46  ;;  %985 = vmatpush3.msra.mxu0 %v417_v49  ;;  %v413_v6 = vld [vmem:[%s1597_s3 + $0x40] sm:$0xff]  ;;  %v443_v11 = vld [vmem:[%s1597_s3 + $0x130] sm:$0xff]  ;;  %v412_v16 = vld [vmem:[%s1597_s3 + $0x38] sm:$0xff] }
  0x12   :  { %1022 = vmatpush3.msra.mxu1 %v448_v48  ;;  %986 = vmatprep.subr.mxu0 %v432_v51  ;;  %v410_v34 = vld [vmem:[%s1597_s3 + $0x28] sm:$0xff]  ;;  %v456_v35 = vld [vmem:[%s1597_s3 + $0x198] sm:$0xff]  ;;  %v425_v36 = vld [vmem:[%s1597_s3 + $0xa0] sm:$0xff] }
  0x13   :  { %1023 = vmatprep.subr.mxu1 %v463_v50  ;;  %987 = vmatpush3.msra.mxu0 %v416_v55  ;;  %v440_v39 = vld [vmem:[%s1597_s3 + $0x118] sm:$0xff]  ;;  %v409_v40 = vld [vmem:[%s1597_s3 + $0x20] sm:$0xff]  ;;  %v455_v43 = vld [vmem:[%s1597_s3 + $0x190] sm:$0xff] }
  0x14   :  { %1024 = vmatpush3.msra.mxu1 %v447_v52  ;;  %988 = vmatprep.subr.mxu0 %v431_v57  ;;  %v424_v49 = vld [vmem:[%s1597_s3 + $0x98] sm:$0xff]  ;;  %v439_v50 = vld [vmem:[%s1597_s3 + $0x110] sm:$0xff] }
  0x15   :  { %1025 = vmatprep.subr.mxu1 %v462_v56  ;;  %989 = vmatpush3.msra.mxu0 %v415_v59  ;;  %v408_v52 = vld [vmem:[%s1597_s3 + $0x18] sm:$0xff]  ;;  %v423_v55 = vld [vmem:[%s1597_s3 + $0x90] sm:$0xff]  ;;  %v438_v56 = vld [vmem:[%s1597_s3 + $0x108] sm:$0xff] }
  0x16   :  { %1026 = vmatpush3.msra.mxu1 %v446_v58  ;;  %990 = vmatprep.subr.mxu0 %v430_v61  ;;  %v407_v61 = vld [vmem:[%s1597_s3 + $0x10] sm:$0xff] }
  0x17   :  { %1027 = vmatprep.subr.mxu1 %v461_v60  ;;  %991 = vmatpush3.msra.mxu0 %v414_v0  ;;  %v437_v0 = vld [vmem:[%s1597_s3 + $0x100] sm:$0xff] }
  0x18   :  { %1028 = vmatpush3.msra.mxu1 %v445_v62  ;;  %992 = vmatprep.subr.mxu0 %v429_v2  ;;  %v453_v62 = vld [vmem:[%s1597_s3 + $0x180] sm:$0xff] }
  0x19   :  { %1029 = vmatprep.subr.mxu1 %v460_v1  ;;  %993 = vmatpush3.msra.mxu0 %v413_v6  ;;  %v406_v1 = vld [vmem:[%s1597_s3 + $0x8] sm:$0xff]  ;;  %v421_v6 = vld [vmem:[%s1597_s3 + $0x80] sm:$0xff] }
  0x1a   :  { %1030 = vmatpush3.msra.mxu1 %v444_v3  ;;  %994 = vmatprep.subr.mxu0 %v428_v8 }
  0x1b   :  { %1031 = vmatprep.subr.mxu1 %v459_v7  ;;  %995 = vmatpush3.msra.mxu0 %v412_v16  ;;  %v405_v7 = vld [vmem:[%s1597_s3] sm:$0xff]  ;;  %v974_v16 = vld [vmem:[%s1601_s7 + $0x18] sm:$0xff] }
  0x1c   :  { %1032 = vmatpush3.msra.mxu1 %v443_v11  ;;  %v970_v11 = vld [vmem:[%s1601_s7 + $0x48] sm:$0xff] }
  0x82   :  { %v43_v17 = vpop.permute.xlu0 %42  ;;  %v1247_v44 = vpop.permute.xlu1 %353 }
  0x86   :  { %v1273_v53 = vpop.permute.xlu0 %272  ;;  %v1275_v54 = vpop.permute.xlu1 %327 }
  0x8a   :  { %v330_v63 = vpop.permute.xlu0 %329 }
  0x8b   :  { %v336_v37 = vsel %vm335_vm3, %v1275_v54, %v330_v63 }
  0xc6   :  { %v128_v18 = vpop.f32.mrf.mxu0  ;;  %v199_v19 = vpop.f32.mrf.mxu1 }
  0xc7   :  { %v129_v20 = vadd.f32 %v128_v18, %v43_v17  ;;  %v200_v25 = vadd.f32 %v199_v19, %v43_v17  ;;  %v427_v19 = vld [vmem:[%s1597_s3 + $0xb0] sm:$0xff] }
  0xc8   :  { %v130_v21 = vpop.f32.mrf.mxu0  ;;  %v201_v24 = vpop.f32.mrf.mxu1  ;;  %996 = vmatprep.subr.mxu0 %v427_v19 }
  0xc9   :  { %v131_v22 = vadd.f32 %v130_v21, %v43_v17  ;;  %208 = vrot.lane.b32.xlu1 %v129_v20, %s1100_s26  ;;  %v202_v27 = vadd.f32 %v201_v24, %v43_v17  ;;  %v458_v17 = vld [vmem:[%s1597_s3 + $0x1a8] sm:$0xff]  ;;  %v457_v24 = vld [vmem:[%s1597_s3 + $0x1a0] sm:$0xff] }
  0xca   :  { %1033 = vmatprep.subr.mxu1 %v458_v17  ;;  %v442_v20 = vld [vmem:[%s1597_s3 + $0x128] sm:$0xff] }
  0xcb   :  { %210 = vrot.lane.b32.xlu0 %v131_v22, %s1100_s26  ;;  %v411_v22 = vld [vmem:[%s1597_s3 + $0x30] sm:$0xff]  ;;  %1034 = vmatpush3.msra.mxu1 %v442_v20  ;;  %v227_v20 = vld [vmem:[%s1602_s8] sm:$0xf] }
  0xcc   :  { %997 = vmatpush3.msra.mxu0 %v411_v22  ;;  %1035 = vmatprep.subr.mxu1 %v457_v24 }
  0xcd   :  { %212 = vrot.lane.b32.xlu1 %v200_v25, %s1100_s26 }
  0xcf   :  { %214 = vrot.lane.b32.xlu0 %v202_v27, %s1100_s26  ;;  %v426_v27 = vld [vmem:[%s1597_s3 + $0xa8] sm:$0xff] }
  0xd0   :  { %998 = vmatprep.subr.mxu0 %v426_v27 }
  0xd1   :  { %331 = vrot.lane.b32.xlu1 %v322_v28, %s1099_s25  ;;  %v441_v28 = vld [vmem:[%s1597_s3 + $0x120] sm:$0xff]  ;;  %999 = vmatpush3.msra.mxu0 %v410_v34 }
  0xd2   :  { %1036 = vmatpush3.msra.mxu1 %v441_v28  ;;  %1000 = vmatprep.subr.mxu0 %v425_v36  ;;  %v240_v28 = vrot.slane %v227_v20, %v239_v23 }
  0xd3   :  { %333 = vrot.lane.b32.xlu0 %v326_v29, %s1099_s25  ;;  %1037 = vmatprep.subr.mxu1 %v456_v35 }
  0xd4   :  { %1038 = vmatpush3.msra.mxu1 %v440_v39  ;;  %1001 = vmatpush3.msra.mxu0 %v409_v40  ;;  %v390_v39 = vld [vmem:[%s1599_s5 + $0x8] sm:$0xff] }
  0xd5   :  { %257 = vperm.xlu1 %1068, %v961_v30   ;;  %1039 = vmatprep.subr.mxu1 %v455_v43 }
  0xd6   :  { %1002 = vmatprep.subr.mxu0 %v424_v49  ;;  %1040 = vmatpush3.msra.mxu1 %v439_v50  ;;  %v391_v49 = vld [vmem:[%s1599_s5 + $0x10] sm:$0xff]  ;;  %v392_v50 = vld [vmem:[%s1599_s5 + $0x18] sm:$0xff] }
  0xd7   :  { %1003 = vmatpush3.msra.mxu0 %v408_v52 }
  0xd8   :  { %1004 = vmatprep.subr.mxu0 %v423_v55 }
  0xd9   :  { %1005 = vmatpush3.msra.mxu0 %v407_v61 }
 0x13b   :  { %v209_v5 = vpop.permute.xlu1 %208 }
 0x13c   :  { %v1323_v9 = vsel %vm216_vm2, 0.0, %v209_v5 }
 0x13d   :  { %v211_v14 = vpop.permute.xlu0 %210  ;;  %v275_v15 = vmul.f32 %v1273_v53, %v1323_v9  ;;  %v344_v2 = vmul.f32 %v1275_v54, %v1323_v9  ;;  %v967_v54 = vld [vmem:[%s1601_s7 + $0x40] sm:$0xff] }
 0x13e   :  { %v1337_v18 = vsel %vm216_vm2, %v209_v5, %v211_v14 }
 0x13f   :  { %285 = vrot.lane.b32.xlu0 %v275_v15, %s1101_s23  ;;  %v213_v21 = vpop.permute.xlu1 %212  ;;  %v276_v30 = vmul.f32 %v1273_v53, %v1337_v18  ;;  %v345_v41 = vmul.f32 %v336_v37, %v1337_v18  ;;  %v356_v8 = vmul.f32 %v1247_v44, %v344_v2  ;;  %v972_v15 = vld [vmem:[%s1601_s7 + $0x10] sm:$0xff] }
 0x140   :  { %v1353_v25 = vsel %vm216_vm2, %v211_v14, %v213_v21  ;;  %v969_v14 = vld [vmem:[%s1603_s9 + $0x2] ss:$0 sm:$0xff] }
 0x141   :  { %v215_v29 = vpop.permute.xlu0 %214  ;;  %v277_v31 = vmul.f32 %v1273_v53, %v1353_v25  ;;  %v357_v57 = vmul.f32 %v1247_v44, %v345_v41  ;;  %v251_v35 = vmul.f32 %v240_v28, %v1353_v25 }
 0x142   :  { %v1366_v32 = vsel %vm216_vm2, %v213_v21, %v215_v29  ;;  %v226_v33 = vsel %vm216_vm2, %v215_v29, 0.0  ;;  %v236_v21 = vrot.slane %v227_v20, %v235_v13  ;;  %v244_v29 = vrot.slane %v227_v20, %v243_v26 }
 0x143   :  { %287 = vrot.lane.b32.xlu0 %v276_v30, %s1101_s23  ;;  %289 = vrot.lane.b32.xlu1 %v277_v31, %s1101_s23  ;;  %v332_v38 = vpop.permute.xlu1 %331  ;;  %v279_v45 = vmul.f32 %v1273_v53, %v226_v33  ;;  %v278_v48 = vmul.f32 %v1273_v53, %v1366_v32  ;;  %v454_v53 = vld [vmem:[%s1597_s3 + $0x188] sm:$0xff]  ;;  %v232_v13 = vrot.slane %v227_v20, %v231_v12 }
 0x144   :  { %v337_v42 = vsel %vm335_vm3, %v330_v63, %v332_v38  ;;  %1041 = vmatprep.subr.mxu1 %v454_v53  ;;  %v422_v63 = vld [vmem:[%s1597_s3 + $0x88] sm:$0xff]  ;;  %v250_v27 = vmul.f32 %v236_v21, %v1337_v18  ;;  %v252_v36 = vmul.f32 %v244_v29, %v1366_v32 }
 0x145   :  { %v346_v46 = vmul.f32 %v337_v42, %v1353_v25  ;;  %v334_v47 = vpop.permute.xlu0 %333  ;;  %1042 = vmatpush3.msra.mxu1 %v438_v56  ;;  %1006 = vmatprep.subr.mxu0 %v422_v63  ;;  %v398_v25 = vld [vmem:[%s1600_s6 + $0x8] sm:$0xff]  ;;  %v389_v63 = vld [vmem:[%s1599_s5] sm:$0xff]  ;;  %s1104_s5 = smov 1  }
 0x146   :  { %v338_v51 = vsel %vm335_vm3, %v332_v38, %v334_v47  ;;  %v348_v59 = vmul.f32 %v334_v47, %v226_v33  ;;  %1043 = vmatprep.subr.mxu1 %v453_v62  ;;  %1007 = vmatpush3.msra.mxu0 %v406_v1 }
 0x147   :  { %291 = vrot.lane.b32.xlu0 %v278_v48, %s1101_s23  ;;  %293 = vrot.lane.b32.xlu1 %v279_v45, %s1101_s23  ;;  %v347_v58 = vmul.f32 %v338_v51, %v1366_v32  ;;  %v358_v60 = vmul.f32 %v1247_v44, %v346_v46  ;;  %v249_v32 = vmul.f32 %v232_v13, %v1323_v9  ;;  %s1105_s23 = smov 127   ;;  %v784_v13 = vld [vmem:[%s1598_s4 + $0x40] sm:$0xff] }
 0x148   :  { %v360_v3 = vmul.f32 %v1247_v44, %v348_v59  ;;  %1044 = vmatpush3.msra.mxu1 %v437_v0  ;;  %1008 = vmatprep.subr.mxu0 %v421_v6 }
 0x149   :  { %v359_v5 = vmul.f32 %v1247_v44, %v347_v58  ;;  %1009 = vmatpush3.msra.mxu0 %v405_v7  ;;  %v971_v44 = vld [vmem:[%s1601_s7 + $0x8] sm:$0xff]  ;;  %v400_v58 = vld [vmem:[%s1600_s6 + $0x18] sm:$0xff] }
 0x14a   :  { %1050 = vmatprep.subr.mxu0 %v1097_v4 }
 0x14b   :  { %368 = vrot.lane.b32.xlu1 %v357_v57, %s1102_s21  ;;  %370 = vrot.lane.b32.xlu0 %v358_v60, %s1102_s21  ;;  %v399_v57 = vld [vmem:[%s1600_s6 + $0x10] sm:$0xff] }
 0x14f   :  { %372 = vrot.lane.b32.xlu1 %v359_v5, %s1102_s21  ;;  %374 = vrot.lane.b32.xlu0 %v360_v3, %s1102_s21  ;;  %v397_v5 = vld [vmem:[%s1600_s6] sm:$0xff] }
 0x150   :  { %v258_v17 = vpop.permute.xlu1 %257 }
 0x151   :  { %v261_v34 = vmul.f32 %v258_v17, %v250_v27  ;;  %v262_v41 = vmul.f32 %v258_v17, %v251_v35  ;;  %v263_v10 = vmul.f32 %v258_v17, %v252_v36  ;;  %v260_v9 = vmul.f32 %v258_v17, %v249_v32  ;;  %v966_v17 = vld [vmem:[%s1601_s7 + $0x38] sm:$0xff]  ;;  %v781_v35 = vld [vmem:[%s1598_s4 + $0x28] sm:$0xff]  ;;  %v965_v36 = vld [vmem:[%s1603_s9] ss:$0 sm:$0xff] }
 0x153   :  { %366 = vrot.lane.b32.xlu1 %v356_v8, %s1102_s21  ;;  %638 = vperm.xlu0 %1067, %v967_v54   ;;  %s947_s21 = sshll.u32 %s1108_s20, 4  ;;  %s948_s21 = int_to_ptr.vmem [resolvable:$true] %s947_s21 }
 0x154   :  { %p1080_p1 = scmp.lt.s32.totalorder %s948_s21, %s948_s21 }
 0x157   :  { %662 = vperm.xlu1 %1068, %v970_v11  }
 0x15b   :  { %654 = vrot.lane.b32.xlu1 %v969_v14, %s1103_s13 }
 0x15f   :  { %675 = vperm.xlu1 %1068, %v971_v44  }
 0x163   :  { %683 = vperm.xlu1 %1068, %v972_v15  }
 0x167   :  { %699 = vperm.xlu1 %1068, %v974_v16  }
 0x1b1   :  { %v286_v19 = vpop.permute.xlu0 %285 }
 0x1b5   :  { %v288_v22 = vpop.permute.xlu0 %287  ;;  %v290_v24 = vpop.permute.xlu1 %289 }
 0x1b6   :  { %v297_v33 = vsel %vm295_vm4, %v288_v22, %v290_v24  ;;  %v296_v48 = vsel %vm295_vm4, %v286_v19, %v288_v22 }
 0x1b7   :  { %v305_v18 = vadd.f32 %v297_v33, %v261_v34  ;;  %v304_v59 = vadd.f32 %v296_v48, %v260_v9  ;;  %v788_v33 = vld [vmem:[%s1598_s4 + $0x60] sm:$0xff]  ;;  %v785_v34 = vld [vmem:[%s1598_s4 + $0x48] sm:$0xff]  ;;  %v791_v48 = vld [vmem:[%s1598_s4 + $0x78] sm:$0xff] }
 0x1b8   :  { %v780_v9 = vld [vmem:[%s1598_s4 + $0x20] sm:$0xff] }
 0x1b9   :  { %v292_v30 = vpop.permute.xlu0 %291  ;;  %v294_v31 = vpop.permute.xlu1 %293 }
 0x1ba   :  { %v298_v23 = vsel %vm295_vm4, %v290_v24, %v292_v30  ;;  %v299_v26 = vsel %vm295_vm4, %v292_v30, %v294_v31  ;;  %v789_v31 = vld [vmem:[%s1598_s4 + $0x68] sm:$0xff] }
 0x1bb   :  { %v306_v42 = vadd.f32 %v298_v23, %v262_v41  ;;  %v307_v43 = vadd.f32 %v299_v26, %v263_v10  ;;  %819 = vmatprep.subr.mxu1 %v789_v31 }
 0x1bd   :  { %v371_v37 = vpop.permute.xlu0 %370  ;;  %v369_v38 = vpop.permute.xlu1 %368 }
 0x1be   :  { %v378_v40 = vsel %vm376_vm5, %v369_v38, %v371_v37 }
 0x1bf   :  { %v386_v12 = vadd.f32 %v378_v40, %v305_v18 }
 0x1c1   :  { %v394_v45 = vmul.f32 %v390_v39, %v386_v12  ;;  %v375_v46 = vpop.permute.xlu0 %374  ;;  %v373_v47 = vpop.permute.xlu1 %372 }
 0x1c2   :  { %v379_v51 = vsel %vm376_vm5, %v371_v37, %v373_v47  ;;  %v380_v52 = vsel %vm376_vm5, %v373_v47, %v375_v46  ;;  %v694_v47 = vld [vmem:[%s1596_s2] sm:$0xff] }
 0x1c3   :  { %v387_v53 = vadd.f32 %v379_v51, %v306_v42  ;;  %v388_v55 = vadd.f32 %v380_v52, %v307_v43  ;;  %v1500_v56 = vadd.f32 %v398_v25, %v394_v45  ;;  %v786_v51 = vld [vmem:[%s1598_s4 + $0x50] sm:$0xff]  ;;  %v783_v52 = vld [vmem:[%s1598_s4 + $0x38] sm:$0xff] }
 0x1c5   :  { %v395_v60 = vmul.f32 %v391_v49, %v387_v53  ;;  %v396_v61 = vmul.f32 %v392_v50, %v388_v55  ;;  %533 = vmatprep.mubr.f32.mxu0 %v1500_v56  ;;  %v367_v62 = vpop.permute.xlu1 %366  ;;  %v790_v49 = vld [vmem:[%s1598_s4 + $0x70] sm:$0xff]  ;;  %v787_v50 = vld [vmem:[%s1598_s4 + $0x58] sm:$0xff]  ;;  %v777_v55 = vld [vmem:[%s1598_s4 + $0x8] sm:$0xff] }
 0x1c6   :  { %v377_v0 = vsel %vm376_vm5, %v367_v62, %v369_v38  ;;  %v782_v53 = vld [vmem:[%s1598_s4 + $0x30] sm:$0xff] }
 0x1c7   :  { %v1513_v1 = vadd.f32 %v399_v57, %v395_v60  ;;  %v385_v2 = vadd.f32 %v377_v0, %v304_v59  ;;  %v1515_v3 = vadd.f32 %v400_v58, %v396_v61  ;;  %v776_v57 = vld [vmem:[%s1598_s4] sm:$0xff]  ;;  %v778_v58 = vld [vmem:[%s1598_s4 + $0x10] sm:$0xff] }
 0x1c9   :  { %v393_v6 = vmul.f32 %v389_v63, %v385_v2  ;;  %603 = vmatprep.mubr.f32.mxu1 %v1515_v3 }
 0x1ca   :  { %604 = vmatmul.mubr.f32.vlgmr.msra.gmra.mxu1 %v1513_v1 }
 0x1cb   :  { %v1522_v7 = vadd.f32 %v397_v5, %v393_v6  ;;  %859 = vmatprep.mubr.f32.mxu1 %v1097_v4  ;;  %820 = vmatpush1.msra.mxu1 %v788_v33 }
 0x1cc   :  { %821 = vmatprep.subr.mxu1 %v785_v34 }
 0x1cd   :  { %534 = vmatmul.mubr.f32.vlgmr.msra.gmra.mxu0 %v1522_v7  ;;  %822 = vmatpush1.msra.mxu1 %v784_v13 }
 0x1ce   :  { %v639_v19 = vpop.permute.xlu0 %638  ;;  %1052 = vmatprep.mubr.msk.f32.mxu0 %vm1107_vm8, %v1097_v4  ;;  %823 = vmatprep.subr.mxu1 %v781_v35 }
 0x1cf   :  { %824 = vmatpush1.msra.mxu1 %v780_v9 }
 0x1d0   :  { %825 = vmatprep.subr.mxu1 %v777_v55 }
 0x1d1   :  { %826 = vmatpush1.msra.mxu1 %v776_v57 }
 0x1d2   :  { %v663_v20 = vpop.permute.xlu1 %662 }
 0x1d6   :  { %v655_v24 = vpop.permute.xlu1 %654 }
 0x1da   :  { %v676_v26 = vpop.permute.xlu1 %675 }
 0x1de   :  { %v684_v12 = vpop.permute.xlu1 %683 }
 0x1e2   :  { %v700_v59 = vpop.permute.xlu1 %699 }
 0x28a   :  { %v1045_v54 = vpop.f32.mrf.mxu1 }
 0x28c   :  { %v1046_v8 = vpop.f32.mrf.mxu1 }
 0x28d   :  { %v1010_v11 = vpop.f32.mrf.mxu0  ;;  %v1047_v44 = vadd.f32 %v1046_v8, %v1045_v54 }
 0x28f   :  { %v1011_v14 = vpop.f32.mrf.mxu0 }
 0x290   :  { %v1012_v15 = vadd.f32 %v1011_v14, %v1010_v11 }
 0x292   :  { %v606_v16 = vadd.f32 %v1047_v44, %v1012_v15 }
 0x294   :  { %610 = vrot.lane.b32.xlu0 %v606_v16, %s1104_s5 }
 0x298   :  { %629 = vperm.xlu0 %1067, %v966_v17  }
 0x306   :  { %v611_v21 = vpop.permute.xlu0 %610 }
 0x307   :  { %v614_v22 = vsel %vm613_vm6, 0.0, %v611_v21 }
 0x308   :  { %v616_v27 = vsel %vm615_vm7, %v614_v22, 0.0 }
 0x309   :  { %v641_v28 = vmul.f32 %v639_v19, %v616_v27  ;;  %v657_v29 = vmul.f32 %v655_v24, %v616_v27  ;;  %v624_v37 = vmul.f32 %v965_v36, %v616_v27 }
 0x30b   :  { %643 = vrot.lane.b32.xlu0 %v641_v28, %s1105_s23  ;;  %v665_v30 = vmul.f32 %v663_v20, %v657_v29 }
 0x30f   :  { %667 = vrot.lane.b32.xlu0 %v665_v30, %s1106_s15 }
 0x313   :  { %v630_v18 = vpop.permute.xlu0 %629 }
 0x314   :  { %v632_v23 = vmul.f32 %v630_v18, %v624_v37 }
 0x37d   :  { %v644_v38 = vpop.permute.xlu0 %643 }
 0x37e   :  { %v646_v39 = vadd.f32 %v644_v38, %v632_v23 }
 0x381   :  { %v668_v40 = vpop.permute.xlu0 %667 }
 0x382   :  { %v670_v41 = vadd.f32 %v668_v40, %v646_v39 }
 0x384   :  { %v678_v10 = vmul.f32 %v676_v26, %v670_v41 }
 0x386   :  { %v686_v25 = vadd.f32 %v684_v12, %v678_v10 }
 0x388   :  { %v973_v32 = vmul.f32 -1.442695, %v686_v25 }
 0x38a   :  { %1071 = vpow2.f32 %v973_v32 }
 0x397   :  { %v1072_v42 = vpop.eup %1071 }
 0x398   :  { %v690_v43 = vadd.f32 1.0, %v1072_v42 }
 0x39a   :  { %1073 = vrcp.f32 %v690_v43 }
 0x3a7   :  { %v1074_v45 = vpop.eup %1073 }
 0x3a8   :  { %v693_v46 = vmul.f32 %v1074_v45, %v686_v25 }
 0x3aa   :  { %1051 = vmatpush3.msra.mxu0 %v693_v46 }
 0x3ab   :  { %1053 = vmatmul.mubr.msk.f32.vlgmr.msra.gmra.mxu0 %vm702_vm9, %v694_v47  ;;  %890 = vmatprep.subr.mxu0 %v791_v48 }
 0x3ac   :  { %891 = vmatpush1.msra.mxu0 %v790_v49  ;;  %930 = vmatprep.mubr.f32.mxu0 %v1097_v4  ;;  %v779_v4 = vld [vmem:[%s1598_s4 + $0x18] sm:$0xff]  ;;  %s1075_s4 = scalar_lea.vmem %s948_s21, 512 }
 0x3ad   :  { %892 = vmatprep.subr.mxu0 %v787_v50  ;;  %p1076_p0 = scmp.ne.s32.totalorder %s948_s21, %s1075_s4  ;;  %p1081_p2 = scmp.lt.s32.totalorder %s1075_s4, %s1075_s4 }
 0x3ae   :  { %893 = vmatpush1.msra.mxu0 %v786_v51 }
 0x3af   :  { %894 = vmatprep.subr.mxu0 %v783_v52  ;;  %p1082_p3 = por %p1081_p2, %p1080_p1 }
 0x3b0   :  { %895 = vmatpush1.msra.mxu0 %v782_v53 }
 0x3b1   :  { %896 = vmatprep.subr.mxu0 %v779_v4  ;;  %p1083_p4 = pnand %p1082_p3, %p1076_p0 }
 0x3b2   :  { %897 = vmatpush1.msra.mxu0 %v778_v58 }
 0x46b   :  { %v772_v60 = vpop.f32.mrf.mxu0 }
 0x46c   :  { %v773_v61 = vadd.f32 %v772_v60, %v700_v59 }
 0x46d   :  { %v1054_v62 = vpop.f32.mrf.mxu0 }
 0x46e   :  { %976 = vmatmul.mubr.msk.f32.vlgmr.msra.gmra.mxu1 %vm335_vm3, %v773_v61  ;;  %977 = vmatmul.mubr.msk.f32.vlgmr.msra.gmra.mxu0 %vm335_vm3, %v773_v61 }
 0x52e   :  { %v861_v63 = vpop.f32.mrf.mxu1  ;;  %v932_v0 = vpop.f32.mrf.mxu0 }
 0x52f   :  { %v862_v2 = vadd.f32 %v861_v63, %v1522_v7  ;;  %v933_v5 = vadd.f32 %v932_v0, %v1513_v1 }
 0x530   :  { %v863_v6 = vpop.f32.mrf.mxu1  ;;  %v934_v54 = vpop.f32.mrf.mxu0 }
 0x531   :  { %937 = vst [vmem:[#allocation2] sm:$0xff] %v862_v2  ;;  %939 = vst [vmem:[#allocation2 + $0x10] sm:$0xff] %v933_v5  ;;  %v864_v8 = vadd.f32 %v863_v6, %v1500_v56  ;;  %v935_v11 = vadd.f32 %v934_v54, %v1515_v3 }
 0x533   :  { %938 = vst [vmem:[#allocation2 + $0x8] sm:$0xff] %v864_v8  ;;  %940 = vst [vmem:[#allocation2 + $0x18] sm:$0xff] %v935_v11 }
 0x534   :  { %1086 = shalt.err (!%p1083_p4)
}
 0x535   :  { %950 = dma.vmem_to_hbm [thread:$0]  %s948_s21, 512, %s1604_s10, [#allocation3]  }
 0x536   :  { %1095 = dma.done.wait [#allocation3], 512  }
 0x537   :  { %1096 = vsyncadd [#allocation3], 4294966784 }
 0x538   :  { %954 = vsyncpa [#allocation3], 1 }

</bundles_post_ra>
